<compile_context>
chip_gen: v7x
topology: tpu7x:2x2x1
jax: 0.10.0
libtpu: 0.0.40
codegen_flags: <defaults>
</compile_context>

<pallas_src>
import jax
import jax.numpy as jnp
from jax.experimental import pallas as pl
from jax.experimental.pallas import tpu as pltpu


def _round_up(x, m):
    return -(-x // m) * m


def _make_kernel(n_valid, n_pad, c_pad, cq_pad, tq):
    """Builds the kernel closed over static sizes."""

    def kernel(x_ref, wvk_ref, bvk_ref, wq_ref, bq_ref, gamma_ref, o_ref,
               v_ref, k_ref):
        qi = pl.program_id(1)

        # ---- once per batch element: fused V+K projection, cached in VMEM ----
        @pl.when(qi == 0)
        def _():
            x_bf = x_ref[0].astype(jnp.bfloat16)                       # (Cp, Np)
            vk = jnp.dot(wvk_ref[...], x_bf,
                         preferred_element_type=jnp.float32) + bvk_ref[...]
            v_ref[...] = vk[:c_pad].astype(jnp.bfloat16)               # (Cp, Np)
            k_ref[...] = vk[c_pad:].astype(jnp.bfloat16)               # (Cqp, Np)

        # ---- per query tile ----
        start = pl.multiple_of(qi * tq, tq)
        xq = x_ref[0, :, pl.ds(start, tq)]                             # (Cp, tq) f32

        q = jnp.dot(wq_ref[...], xq.astype(jnp.bfloat16),
                    preferred_element_type=jnp.float32) + bq_ref[...]  # (Cqp, tq)

        # energy[i, j] = sum_c q[c, i] * k[c, j]
        energy = jax.lax.dot_general(
            q.astype(jnp.bfloat16), k_ref[...],
            (((0,), (0,)), ((), ())),
            preferred_element_type=jnp.float32)                        # (tq, Np)

        if n_pad != n_valid:  # mask padded key columns (static condition)
            col = jax.lax.broadcasted_iota(jnp.int32, energy.shape, 1)
            energy = jnp.where(col < n_valid, energy, -1e30)

        # numerically-stable softmax with deferred normalization
        m = jnp.max(energy, axis=-1, keepdims=True)
        p = jnp.exp(energy - m)                                        # (tq, Np) f32
        p_bf = p.astype(jnp.bfloat16)

        # row sums as a (1, tq) row via a tiny ones-matmul (no (tq,1) transpose)
        ones_row = jnp.ones((1, n_pad), jnp.bfloat16)
        l_row = jax.lax.dot_general(
            ones_row, p_bf, (((1,), (1,)), ((), ())),
            preferred_element_type=jnp.float32)                        # (1, tq)

        # out_un[c, i] = sum_j v[c, j] * p[i, j]
        out_un = jax.lax.dot_general(
            v_ref[...], p_bf, (((1,), (1,)), ((), ())),
            preferred_element_type=jnp.float32)                        # (Cp, tq)

        inv = pl.reciprocal(l_row, approx=True)                        # (1, tq)
        o_ref[0] = gamma_ref[0] * (out_un * inv) + xq

    return kernel


def self_attn_pallas(x_nchw, params):
    """x_nchw: (B, C, W, H) float32.  params: dict of weights (see init_params)."""
    B, C, W, H = x_nchw.shape
    N = W * H
    x_bcn = x_nchw.reshape(B, C, N).astype(jnp.float32)   # free reshape, no transpose

    wq, bq = params["wq"], params["bq"]          # (Cq, C), (Cq,)
    wk, bk = params["wk"], params["bk"]          # (Cq, C), (Cq,)
    wv, bv = params["wv"], params["bv"]          # (C, C),  (C,)
    Cq = wq.shape[0]

    # Pad channels to sublane multiples and tokens to a lane multiple.
    Cp = _round_up(C, 8)
    Cqp = _round_up(Cq, 8)
    Np = _round_up(N, 128)
    tq = 256 if Np % 256 == 0 else 128
    nq = Np // tq

    x_p = jnp.pad(x_bcn, ((0, 0), (0, Cp - C), (0, Np - N)))

    # Weight packing (rows = out channels, cols = in channels); weights in bf16.
    wq_p = jnp.pad(wq, ((0, Cqp - Cq), (0, Cp - C))).astype(jnp.bfloat16)
    bq_p = jnp.pad(bq, (0, Cqp - Cq)).reshape(Cqp, 1).astype(jnp.float32)
    wk_p = jnp.pad(wk, ((0, Cqp - Cq), (0, Cp - C)))
    bk_p = jnp.pad(bk, (0, Cqp - Cq))
    wv_p = jnp.pad(wv, ((0, Cp - C), (0, Cp - C)))
    bv_p = jnp.pad(bv, (0, Cp - C))

    w_vk = jnp.concatenate([wv_p, wk_p], axis=0).astype(jnp.bfloat16)      # (Cp+Cqp, Cp)
    b_vk = jnp.concatenate([bv_p, bk_p], axis=0).reshape(Cp + Cqp, 1).astype(jnp.float32)

    gamma = params["gamma"].reshape(1).astype(jnp.float32)

    # Explicit VMEM budget: double-buffered x / out, bf16 V/K cache, softmax temps.
    est = (2 * Cp * Np * 4                 # x slab double buffer (f32)
           + (Cp + Cqp) * Np * 2           # cached V/K (bf16)
           + 2 * Cp * tq * 4               # out tile double buffer
           + 4 * tq * Np * 4               # energy / p intermediates
           + 4 * (Cp + 2 * Cqp) * Cp * 2   # weights
           + (1 << 20))
    vmem_limit = int(min(max(2 * est, 8 << 20), 48 << 20))

    kernel = _make_kernel(N, Np, Cp, Cqp, tq)

    out = pl.pallas_call(
        kernel,
        out_shape=jax.ShapeDtypeStruct((B, Cp, Np), jnp.float32),
        grid=(B, nq),
        in_specs=[
            pl.BlockSpec((1, Cp, Np), lambda b, qi: (b, 0, 0)),      # x (full token slab)
            pl.BlockSpec((Cp + Cqp, Cp), lambda b, qi: (0, 0)),      # fused Wv|Wk (bf16)
            pl.BlockSpec((Cp + Cqp, 1), lambda b, qi: (0, 0)),       # fused bv|bk
            pl.BlockSpec((Cqp, Cp), lambda b, qi: (0, 0)),           # Wq (bf16)
            pl.BlockSpec((Cqp, 1), lambda b, qi: (0, 0)),            # bq
            pl.BlockSpec(memory_space=pltpu.MemorySpace.SMEM),       # gamma scalar
        ],
        out_specs=pl.BlockSpec((1, Cp, tq), lambda b, qi: (b, 0, qi)),
        scratch_shapes=[
            pltpu.VMEM((Cp, Np), jnp.bfloat16),    # cached V projection
            pltpu.VMEM((Cqp, Np), jnp.bfloat16),   # cached K projection
        ],
        compiler_params=pltpu.CompilerParams(
            dimension_semantics=("parallel", "arbitrary"),
            vmem_limit_bytes=vmem_limit),
    )(x_p, w_vk, b_vk, wq_p, bq_p, gamma)

    return out[:, :C, :N].reshape(B, C, W, H)


def init_params(key, in_dim):
    """Shapes follow Self_Attn.__init__ for the given in_dim (PyTorch layout)."""
    C = in_dim // 2      # conv in_channels (== channel dim of x)
    Cq = in_dim // 8     # query/key out_channels
    ks = jax.random.split(key, 6)
    scale = 1.0 / jnp.sqrt(C)
    params = {
        "wq": jax.random.uniform(ks[0], (Cq, C), jnp.float32, -scale, scale),
        "bq": jax.random.uniform(ks[1], (Cq,), jnp.float32, -scale, scale),
        "wk": jax.random.uniform(ks[2], (Cq, C), jnp.float32, -scale, scale),
        "bk": jax.random.uniform(ks[3], (Cq,), jnp.float32, -scale, scale),
        "wv": jax.random.uniform(ks[4], (C, C), jnp.float32, -scale, scale),
        "bv": jax.random.uniform(ks[5], (C,), jnp.float32, -scale, scale),
        # The module inits gamma = 0 (which makes out == x trivially);
        # use a nonzero deterministic value so the attention path is exercised.
        "gamma": jnp.full((1,), 0.5, jnp.float32),
    }
    return params


def self_attn_reference(x_nchw, params):
    """Pure-JAX f32 reference mirroring the PyTorch forward exactly."""
    B, C, W, H = x_nchw.shape
    N = W * H
    xf = x_nchw.reshape(B, C, N).astype(jnp.float32)                          # (B, C, N)
    q = jnp.einsum("qc,bcn->bqn", params["wq"], xf) + params["bq"][None, :, None]
    k = jnp.einsum("qc,bcn->bqn", params["wk"], xf) + params["bk"][None, :, None]
    v = jnp.einsum("oc,bcn->bon", params["wv"], xf) + params["bv"][None, :, None]
    energy = jnp.einsum("bqi,bqj->bij", q, k)                                  # (B, N, N)
    att = jax.nn.softmax(energy, axis=-1)
    out = jnp.einsum("bcj,bij->bci", v, att)                                   # (B, C, N)
    return (params["gamma"][0] * out + xf).reshape(B, C, W, H)


if __name__ == "__main__":
    in_dim = 32                      # -> C = 16, query/key channels Cq = 4
    B, W, H = 2, 16, 16              # N = 256 -> one 256-wide query tile per batch
    C = in_dim // 2
    key = jax.random.PRNGKey(0)
    kx, kp = jax.random.split(key)
    x = jax.random.normal(kx, (B, C, W, H), jnp.float32)
    params = init_params(kp, in_dim)

    out = jax.block_until_ready(self_attn_pallas(x, params))
    ref = self_attn_reference(x, params)

    assert out.shape == (B, C, W, H)
    err = float(jnp.max(jnp.abs(out - ref)))
    # Tolerance covers bf16 matmul operands (f32 accumulation) and the EUP
    # approximate-reciprocal softmax denominator vs the pure-f32 reference.
    assert err < 3e-2, f"mismatch vs reference: max abs err {err}"
    print("KERNEL_OK")
</pallas_src>

<mosaic_0001>
module attributes {stable_mosaic.version = 11 : i64} {
  func.func @kernel(%arg0: i32, %arg1: i32, %arg2: memref<1x16x256xf32, #tpu.memory_space<vmem>>, %arg3: memref<24x16xbf16, #tpu.memory_space<vmem>>, %arg4: memref<24x1xf32, #tpu.memory_space<vmem>>, %arg5: memref<8x16xbf16, #tpu.memory_space<vmem>>, %arg6: memref<8x1xf32, #tpu.memory_space<vmem>>, %arg7: memref<1xf32, #tpu.memory_space<smem>>, %arg8: memref<1x16x256xf32, #tpu.memory_space<vmem>>, %arg9: memref<16x256xbf16, #tpu.memory_space<vmem>>, %arg10: memref<8x256xbf16, #tpu.memory_space<vmem>>) attributes {dimension_semantics = [#tpu.dimension_semantics<parallel>, #tpu.dimension_semantics<arbitrary>], iteration_bounds = array<i64: 2, 1>, scalar_prefetch = 0 : i64, scratch_operands = 2 : i64, tpu.core_type = #tpu.core_type<tc>, window_params = [{transform_indices = @transform_0, window_bounds = array<i64: 1, 16, 256>}, {pipeline_mode = #tpu.pipeline_mode<synchronous>, transform_indices = @transform_1, window_bounds = array<i64: 24, 16>}, {pipeline_mode = #tpu.pipeline_mode<synchronous>, transform_indices = @transform_2, window_bounds = array<i64: 24, 1>}, {pipeline_mode = #tpu.pipeline_mode<synchronous>, transform_indices = @transform_3, window_bounds = array<i64: 8, 16>}, {pipeline_mode = #tpu.pipeline_mode<synchronous>, transform_indices = @transform_4, window_bounds = array<i64: 8, 1>}, {transform_indices = @transform_5, window_bounds = array<i64: 1>}, {transform_indices = @transform_6, window_bounds = array<i64: 1, 16, 256>}]} {
    %c0_i32 = arith.constant 0 : i32
    %0 = arith.cmpi eq, %arg1, %c0_i32 : i32
    %1 = arith.extui %0 : i1 to i32
    %c0_i32_0 = arith.constant 0 : i32
    %2 = arith.cmpi ne, %1, %c0_i32_0 : i32
    scf.if %2 {
      %c0_19 = arith.constant 0 : index
      %c0_20 = arith.constant 0 : index
      %c0_21 = arith.constant 0 : index
      %37 = vector.load %arg2[%c0_19, %c0_20, %c0_21] : memref<1x16x256xf32, #tpu.memory_space<vmem>>, vector<1x16x256xf32>
      %38 = vector.shape_cast %37 : vector<1x16x256xf32> to vector<16x256xf32>
      %39 = arith.truncf %38 : vector<16x256xf32> to vector<16x256xbf16>
      %c0_22 = arith.constant 0 : index
      %c0_23 = arith.constant 0 : index
      %40 = vector.load %arg3[%c0_22, %c0_23] : memref<24x16xbf16, #tpu.memory_space<vmem>>, vector<24x16xbf16>
      %cst_24 = arith.constant dense<0.000000e+00> : vector<24x256xf32>
      %41 = tpu.matmul %40, %39, %cst_24 {dimension_numbers = #tpu.dot_dimension_numbers<[1], [0], [0], [1], [0, 0, 1, 1], [], []>} : vector<24x16xbf16>, vector<16x256xbf16>, vector<24x256xf32> -> vector<24x256xf32>
      %c0_25 = arith.constant 0 : index
      %c0_26 = arith.constant 0 : index
      %42 = vector.load %arg4[%c0_25, %c0_26] : memref<24x1xf32, #tpu.memory_space<vmem>>, vector<24x1xf32>
      %43 = vector.broadcast %42 : vector<24x1xf32> to vector<24x256xf32>
      %44 = arith.addf %41, %43 : vector<24x256xf32>
      %45 = vector.extract_strided_slice %44 {offsets = [0, 0], sizes = [16, 256], strides = [1, 1]} : vector<24x256xf32> to vector<16x256xf32>
      %46 = arith.truncf %45 : vector<16x256xf32> to vector<16x256xbf16>
      %c0_27 = arith.constant 0 : index
      %c0_28 = arith.constant 0 : index
      %47 = vector.load %arg9[%c0_27, %c0_28] : memref<16x256xbf16, #tpu.memory_space<vmem>>, vector<16x256xbf16>
      tpu.vector_store %arg9[%c0_27, %c0_28], %46 {strides = array<i32>} : memref<16x256xbf16, #tpu.memory_space<vmem>>, vector<16x256xbf16>,
      %48 = vector.extract_strided_slice %44 {offsets = [16, 0], sizes = [8, 256], strides = [1, 1]} : vector<24x256xf32> to vector<8x256xf32>
      %49 = arith.truncf %48 : vector<8x256xf32> to vector<8x256xbf16>
      %c0_29 = arith.constant 0 : index
      %c0_30 = arith.constant 0 : index
      %50 = vector.load %arg10[%c0_29, %c0_30] : memref<8x256xbf16, #tpu.memory_space<vmem>>, vector<8x256xbf16>
      tpu.vector_store %arg10[%c0_29, %c0_30], %49 {strides = array<i32>} : memref<8x256xbf16, #tpu.memory_space<vmem>>, vector<8x256xbf16>,
    } else {
    }
    %c256_i32 = arith.constant 256 : i32
    %3 = arith.muli %arg1, %c256_i32 : i32
    %4 = tpu.assume_multiple %3, 256 : i32
    %c0 = arith.constant 0 : index
    %c0_1 = arith.constant 0 : index
    %5 = arith.index_cast %4 : i32 to index
    %6 = vector.load %arg2[%c0, %c0_1, %5] : memref<1x16x256xf32, #tpu.memory_space<vmem>>, vector<1x16x256xf32>
    %7 = vector.shape_cast %6 : vector<1x16x256xf32> to vector<16x256xf32>
    %c0_2 = arith.constant 0 : index
    %c0_3 = arith.constant 0 : index
    %8 = vector.load %arg5[%c0_2, %c0_3] : memref<8x16xbf16, #tpu.memory_space<vmem>>, vector<8x16xbf16>
    %9 = arith.truncf %7 : vector<16x256xf32> to vector<16x256xbf16>
    %cst = arith.constant dense<0.000000e+00> : vector<8x256xf32>
    %10 = tpu.matmul %8, %9, %cst {dimension_numbers = #tpu.dot_dimension_numbers<[1], [0], [0], [1], [0, 0, 1, 1], [], []>} : vector<8x16xbf16>, vector<16x256xbf16>, vector<8x256xf32> -> vector<8x256xf32>
    %c0_4 = arith.constant 0 : index
    %c0_5 = arith.constant 0 : index
    %11 = vector.load %arg6[%c0_4, %c0_5] : memref<8x1xf32, #tpu.memory_space<vmem>>, vector<8x1xf32>
    %12 = vector.broadcast %11 : vector<8x1xf32> to vector<8x256xf32>
    %13 = arith.addf %10, %12 : vector<8x256xf32>
    %14 = arith.truncf %13 : vector<8x256xf32> to vector<8x256xbf16>
    %c0_6 = arith.constant 0 : index
    %c0_7 = arith.constant 0 : index
    %15 = vector.load %arg10[%c0_6, %c0_7] : memref<8x256xbf16, #tpu.memory_space<vmem>>, vector<8x256xbf16>
    %cst_8 = arith.constant dense<0.000000e+00> : vector<256x256xf32>
    %16 = tpu.matmul %14, %15, %cst_8 {dimension_numbers = #tpu.dot_dimension_numbers<[0], [0], [1], [1], [0, 1, 1, 1], [], []>} : vector<8x256xbf16>, vector<8x256xbf16>, vector<256x256xf32> -> vector<256x256xf32>
    %cst_9 = arith.constant dense<0xFF800000> : vector<256xf32>
    %17 = vector.multi_reduction <maximumf>, %16, %cst_9 [1] : vector<256x256xf32> to vector<256xf32>
    %18 = vector.shape_cast %17 : vector<256xf32> to vector<256x1xf32>
    %19 = vector.broadcast %18 : vector<256x1xf32> to vector<256x256xf32>
    %20 = arith.subf %16, %19 : vector<256x256xf32>
    %21 = math.exp %20 : vector<256x256xf32>
    %22 = arith.truncf %21 : vector<256x256xf32> to vector<256x256xbf16>
    %cst_10 = arith.constant 1.000000e+00 : bf16
    %23 = vector.broadcast %cst_10 : bf16 to vector<1x256xbf16>
    %cst_11 = arith.constant dense<0.000000e+00> : vector<1x256xf32>
    %24 = tpu.matmul %23, %22, %cst_11 {dimension_numbers = #tpu.dot_dimension_numbers<[1], [1], [0], [0], [0, 0, 1, 0], [], []>} : vector<1x256xbf16>, vector<256x256xbf16>, vector<1x256xf32> -> vector<1x256xf32>
    %c0_12 = arith.constant 0 : index
    %c0_13 = arith.constant 0 : index
    %25 = vector.load %arg9[%c0_12, %c0_13] : memref<16x256xbf16, #tpu.memory_space<vmem>>, vector<16x256xbf16>
    %cst_14 = arith.constant dense<0.000000e+00> : vector<16x256xf32>
    %26 = tpu.matmul %25, %22, %cst_14 {dimension_numbers = #tpu.dot_dimension_numbers<[1], [1], [0], [0], [0, 0, 1, 0], [], []>} : vector<16x256xbf16>, vector<256x256xbf16>, vector<16x256xf32> -> vector<16x256xf32>
    %27 = tpu.reciprocal %24 {approx = true} : vector<1x256xf32> -> vector<1x256xf32>
    %c0_15 = arith.constant 0 : index
    %28 = memref.load %arg7[%c0_15] : memref<1xf32, #tpu.memory_space<smem>>
    %29 = vector.broadcast %27 : vector<1x256xf32> to vector<16x256xf32>
    %30 = arith.mulf %26, %29 : vector<16x256xf32>
    %31 = vector.broadcast %28 : f32 to vector<16x256xf32>
    %32 = arith.mulf %31, %30 : vector<16x256xf32>
    %33 = arith.addf %32, %7 : vector<16x256xf32>
    %c0_16 = arith.constant 0 : index
    %c0_17 = arith.constant 0 : index
    %c0_18 = arith.constant 0 : index
    %34 = vector.load %arg8[%c0_16, %c0_17, %c0_18] : memref<1x16x256xf32, #tpu.memory_space<vmem>>, vector<1x16x256xf32>
    %35 = vector.shape_cast %34 : vector<1x16x256xf32> to vector<16x256xf32>
    %36 = vector.shape_cast %33 : vector<16x256xf32> to vector<1x16x256xf32>
    tpu.vector_store %arg8[%c0_16, %c0_17, %c0_18], %36 {strides = array<i32>} : memref<1x16x256xf32, #tpu.memory_space<vmem>>, vector<1x16x256xf32>,
    return
  }
  func.func @transform_0(%arg0: i32, %arg1: i32) -> (i32, i32, i32) {
    %c0_i32 = arith.constant 0 : i32
    %c0_i32_0 = arith.constant 0 : i32
    %c0_i32_1 = arith.constant 0 : i32
    return %arg0, %c0_i32, %c0_i32_0 : i32, i32, i32
  }
  func.func @transform_1(%arg0: i32, %arg1: i32) -> (i32, i32) {
    %c0_i32 = arith.constant 0 : i32
    %c0_i32_0 = arith.constant 0 : i32
    %c0_i32_1 = arith.constant 0 : i32
    return %c0_i32, %c0_i32_0 : i32, i32
  }
  func.func @transform_2(%arg0: i32, %arg1: i32) -> (i32, i32) {
    %c0_i32 = arith.constant 0 : i32
    %c0_i32_0 = arith.constant 0 : i32
    %c0_i32_1 = arith.constant 0 : i32
    return %c0_i32, %c0_i32_0 : i32, i32
  }
  func.func @transform_3(%arg0: i32, %arg1: i32) -> (i32, i32) {
    %c0_i32 = arith.constant 0 : i32
    %c0_i32_0 = arith.constant 0 : i32
    %c0_i32_1 = arith.constant 0 : i32
    return %c0_i32, %c0_i32_0 : i32, i32
  }
  func.func @transform_4(%arg0: i32, %arg1: i32) -> (i32, i32) {
    %c0_i32 = arith.constant 0 : i32
    %c0_i32_0 = arith.constant 0 : i32
    %c0_i32_1 = arith.constant 0 : i32
    return %c0_i32, %c0_i32_0 : i32, i32
  }
  func.func @transform_5(%arg0: i32, %arg1: i32) -> i32 {
    %c0_i32 = arith.constant 0 : i32
    %c0_i32_0 = arith.constant 0 : i32
    return %c0_i32 : i32
  }
  func.func @transform_6(%arg0: i32, %arg1: i32) -> (i32, i32, i32) {
    %c0_i32 = arith.constant 0 : i32
    %c0_i32_0 = arith.constant 0 : i32
    return %arg0, %c0_i32, %arg1 : i32, i32, i32
  }
}

</mosaic_0001>

<bundles_post_ra>
// kernel: tpu_custom_call.1
= control target key start
LH: loop header
LB: loop body
LE: loop exit
PB: predicated region body
PF: predicated region fallthrough
CT: control target
= control target key end

     0   :  { %s2216_s0 = inlined_call_operand.hbm [shape: f32[2,16,256], index: 0, kind: input, shape index: {}]   ;;  %s2217_s1 = inlined_call_operand.vmem [shape: bf16[24,16], index: 1, kind: input, shape index: {}]   ;;  %s2218_s2 = inlined_call_operand.vmem [shape: f32[24,1], index: 2, kind: input, shape index: {}]   ;;  %s2219_s3 = inlined_call_operand.vmem [shape: bf16[8,16], index: 3, kind: input, shape index: {}]   ;;  %s2220_s4 = inlined_call_operand.vmem [shape: f32[8,1], index: 4, kind: input, shape index: {}]   ;;  %s2221_s5 = inlined_call_operand.<no memory space> [shape: f32[1], index: 5, kind: input, shape index: {}]   ;;  %s2222_s6 = inlined_call_operand.hbm [shape: f32[2,16,256], index: 6, kind: output, shape index: {}]  }
   0x1   :  { %11 = sst [smem:[#allocation4]] %s2221_s5 }
   0x2   :  { %12 = vsyncpa [#allocation6], 0 }
   0x3   :  { %14 = vsyncpa [#allocation6 + $0x1], 0 }
   0x4   :  { %15 = vsyncpa [#allocation7], 0 }
   0x5   :  { %17 = vsyncpa [#allocation7 + $0x1], 0  ;;  %s1699_s23 = smov 0   ;;  %s1701_s24 = smov 0  }
   0x6   :  { %s1703_s25 = smov 0   ;;  %s1705_s26 = smov 0  }
   0x7   :  { %s1707_s27 = smov 0   ;;  %s1709_s28 = smov 0  }
   0x8 LB: > { %s1286_s5 = sadd.s32 4294967295, %s1651_s28   ;;  %s1287_s29 = sadd.s32 4294967294, %s1651_s28   ;;  %s1651_s28 = sphi %s1709_s28, %s23_s28   ;;  %s1647_s27 = sphi %s1707_s27, %s2284_s27   ;;  %s1643_s26 = sphi %s1705_s26, %s2283_s26   ;;  %s1639_s25 = sphi %s1703_s25, %s2282_s25   ;;  %s1635_s24 = sphi %s1701_s24, %s2281_s24   ;;  %s1631_s23 = sphi %s1699_s23, %s2280_s23  }
   0x9   : > { %s35_s30 = sadd.s32 1, %s1647_s27  ;;  %s42_s7 = sadd.s32 1, %s1639_s25 }
   0xa   : > { %p37_p0 = scmp.ge.s32.totalorder %s35_s30, 2  ;;  %p49_p1 = scmp.ne.s32.totalorder %s1639_s25, %s1635_s24 }
   0xb   : > { %p50_p2 = scmp.eq.s32.totalorder %s1651_s28, 0  ;;  %p55_p3 = scmp.ne.s32.totalorder %s1635_s24, %s1631_s23 }
   0xc   : > { %s2286_s30 = smov (%p37_p0, %s35_s30), 0  ;;  %p56_p5 = scmp.eq.s32.totalorder %s1286_s5, 0 }
   0xd   : > { %p1740_p4 = por %p50_p2, %p49_p1  ;;  %s39_s9 = ssub.s32 %s1647_s27, %s2286_s30 }
   0xe   : > { %p186_p6 = scmp.eq.s32.totalorder %s1286_s5, 1  ;;  %p40_p7 = scmp.eq.s32.totalorder %s39_s9, 0 }
   0xf   : > { %p1746_p8 = por %p56_p5, %p55_p3  ;;  %p192_p10 = scmp.eq.s32.totalorder %s1287_s29, 1 }
  0x10   : > { %p1750_p9 = por %p186_p6, %p49_p1  ;;  %p1343_p13 = scmp.lt.s32.totalorder %s1651_s28, 2 }
  0x11   : > { %s1755_s12 = scalar_select %p40_p7, %s1639_s25, %s42_s7  }
  0x12   : > { %s2239_s11 = scalar_select %p1750_p9, 1, 0 }
  0x13   : > { %p1757_p11 = por %p192_p10, %p55_p3  ;;  %s227_s14 = sand.u32 1, %s1639_s25  }
  0x14   : > { %s1290_s15 = sshll.u32 %s227_s14, 5  ;;  %s1326_s16 = sshll.u32 %s1647_s27, 9 }
  0x15   : > { %s2240_s13 = scalar_select %p1757_p11, 1, 0 }
  0x16   : > { %s1768_s19 = scalar_lea.hbm %s2216_s0, %s1326_s16  ;;  %s231_s20 = scalar_lea.vmem [#allocation5], %s1290_s15 }
  0x17   : > { %s238_s21 = sshll.u32 %s231_s20, 4  ;;  %p1774_p0 = pnand %p1343_p13, %p1740_p4  ;;  %s1770_s21 = int_to_ptr.vmem [resolvable:$true] %s238_s21 }
  0x18   : > { %s1779_s5 = scalar_lea.sflag [#allocation6], %s227_s14  ;;  %s1539_s29 = scalar_lea.hbm %s1768_s19, 512 }
  0x19   : > { %p1540_p2 = scmp.ne.s32.totalorder %s1768_s19, %s1539_s29  ;;  %p1541_p3 = pneg %p1774_p0 }
  0x1a   : > { %s1544_s8 = scalar_lea.hbm %s2216_s0, 1024  ;;  %p1545_p4 = scmp.lt.u32.totalorder %s1768_s19, %s2216_s0 }
  0x1b   : > { %p1542_p5 = pnand %p1541_p3, %p1540_p2  ;;  %p1546_p7 = scmp.lt.u32.totalorder %s1544_s8, %s1539_s29 }
  0x1c   : > { %p1548_p13 = scmp.lt.u32.totalorder %s1539_s29, %s1768_s19 }
  0x1d   : > { %p1543_p6 = pneg %p1542_p5  ;;  %p1547_p10 = por %p1546_p7, %p1545_p4 }
  0x1f   : > { %p1549_p12 = por %p1548_p13, %p1547_p10 }
  0x21   : > { %p1550_p1 = pnand %p1549_p12, %p1543_p6 }
  0x23   : > { %1553 = shalt.err (!%p1550_p1)
}
  0x24   : > { %s1554_s14 = scalar_lea.vmem %s1770_s21, 512  ;;  %s1653_s17 = smov [#allocation5]  }
  0x25   : > { %p1555_p2 = scmp.ne.s32.totalorder %s1770_s21, %s1554_s14  ;;  %s1559_s18 = sshll.u32 %s1653_s17, 4  ;;  %s1560_s18 = int_to_ptr.vmem [resolvable:$false] %s1559_s18 }
  0x26   : > { %s1561_s20 = scalar_lea.vmem %s1560_s18, 1024  ;;  %p1562_p9 = scmp.lt.s32.totalorder %s1770_s21, %s1560_s18 }
  0x27   : > { %p1557_p5 = pnand %p1555_p2, %p1541_p3  ;;  %p1563_p4 = scmp.lt.s32.totalorder %s1561_s20, %s1554_s14 }
  0x29   : > { %p1558_p11 = pneg %p1557_p5  ;;  %p1564_p7 = por %p1563_p4, %p1562_p9 }
  0x2b   : > { %p1565_p10 = pnand %p1564_p7, %p1558_p11 }
  0x2d   : > { %1568 = shalt.err (!%p1565_p10)
}
  0x2e   : > { %s1654_s29 = smov 256   ;;  %s1655_s7 = smov 16  }
  0x2f   : > { %1338 = dma.hbm_to_vmem [thread:$0]  (!%p1774_p0), %s1768_s19, 512, %s1770_s21, %s1779_s5, %s1654_s29, %s1654_s29, %s1655_s7  }
  0x30   : > { %p246_p12 = scmp.lt.s32.totalorder %s1651_s28, 3  ;;  %p2242_p1 = scmp.ge.s32.totalorder %s1651_s28, 1 }
  0x32   : > { %p247_p3 = pnand %p2242_p1, %p246_p12 }
  0x34   : > { %250 = sbr.rel (%p247_p3) target bundleno = 1143 (0x477), region = 44 }
  0x3b   : > { %s1811_s9 = sand.u32 1, %s1635_s24  }
  0x3c   : > { %s1294_s8 = sshll.u32 %s1811_s9, 5  ;;  %s253_s15 = scalar_lea.sflag [#allocation6], %s1811_s9 }
  0x3d   : > { %s1817_s16 = scalar_lea.vmem [#allocation5], %s1294_s8 }
  0x3e   : > { %1622 = dma.done.wait (%p1746_p8), %s253_s15, 512  }
  0x3f   : > { %1624 = vsyncadd (%p1746_p8), %s253_s15, 4294966784  ;;  %v1656_v0 = vmov 0   ;;  %v293_v1 = vld [vmem:[%s1817_s16 + $0x8] sm:$0xff]  ;;  %v295_v2 = vld [vmem:[%s1817_s16 + $0x18] sm:$0xff]  ;;  %vm327_vm0 = vcmask 130048   ;;  %vm550_vm1 = vcmask 1043456  }
  0x40   : > { %366 = vmatprep.mubr.bf16.mxu0 %v1656_v0  ;;  %452 = vmatprep.mubr.bf16.mxu1 %v1656_v0  ;;  %v292_v3 = vld [vmem:[%s1817_s16] sm:$0xff]  ;;  %v297_v4 = vpack.c.bf16 %v295_v2, %v293_v1  ;;  %v294_v5 = vld [vmem:[%s1817_s16 + $0x10] sm:$0xff]  ;;  %v1402_v11 = vld [vmem:[%s2217_s1 + $0x8] ss:$0 sps:$4 sm:$0xff]   ;;  %vm501_vm2 = vcmask 64512   ;;  %s1158_s21 = sld [smem:[#allocation4]] }
  0x41   : > { %1399 = vset.pattern.permute.xlu0 %v1656_v0  ;;  %v296_v6 = vpack.c.bf16 %v294_v5, %v292_v3  ;;  %v1401_v7 = vld [vmem:[%s2217_s1] sm:$0xff]   ;;  %v303_v10 = vld [vmem:[%s2218_s2 + $0x10] sm:$0xff]  ;;  %s284_s22 = scalar_lea.vmem [#allocation8], %s1294_s8  ;;  %s1328_s14 = sshll.u32 %s1643_s26, 9 }
  0x42   : > { %334 = vmatprep.subr.bf16.mxu0 %v297_v4  ;;  %420 = vmatprep.subr.bf16.mxu1 %v297_v4  ;;  %v410_v8 = vld [vmem:[%s2220_s4] sm:$0xff]  ;;  %s1200_s5 = sshll.u32 %s284_s22, 4  ;;  %s2167_s26 = scalar_lea.hbm %s2222_s6, %s1328_s14  ;;  %s2158_s5 = int_to_ptr.vmem [resolvable:$true] %s1200_s5 }
  0x43   : > { %335 = vmatpush1.bf16.msra.mxu0 %v296_v6  ;;  %421 = vmatpush1.bf16.msra.mxu1 %v296_v6  ;;  %v407_v9 = vld [vmem:[%s2219_s3] sm:$0xf]  ;;  %s1185_s18 = scalar_lea.sflag [#allocation7], %s1811_s9  ;;  %s1569_s20 = scalar_lea.vmem %s2158_s5, 512 }
  0x44   : > { %413 = vperm.xlu0 %1399, %v410_v8   ;;  %p1570_p8 = scmp.ne.s32.totalorder %s2158_s5, %s1569_s20  ;;  %p2277_p9 = scmp.ne.s32.totalorder %s2239_s11, 0 }
  0x45   : > { %s1658_s29 = smov [#allocation8]  }
  0x46   : > { %1298 = vmatmul.mubr.msk.bf16.vlgmr.msra.gmra.mrb[0].mxu0 %vm327_vm0, %v1401_v7  ;;  %1301 = vmatmul.mubr.msk.bf16.vlgmr.msra.gmra.mrb[0].mxu1 %vm327_vm0, %v407_v9  ;;  %p1571_p11 = pnand %p1570_p8, %p2277_p9  ;;  %s1573_s7 = sshll.u32 %s1658_s29, 4  ;;  %s1574_s7 = int_to_ptr.vmem [resolvable:$false] %s1573_s7 }
  0x47   : > { %376 = vmatprep.mubr.bf16.mxu0 %v1656_v0  ;;  %589 = vmatprep.mubr.bf16.mxu1 %v1656_v0  ;;  %p1576_p6 = scmp.lt.s32.totalorder %s2158_s5, %s1574_s7 }
  0x48   : > { %316 = vperm.xlu0 %1399, %v303_v10   ;;  %p1572_p0 = pneg %p1571_p11 }
  0x4e   : > { %1299 = vmatmul.mubr.msk.bf16.gmra.mrb[4].mxu0 %vm327_vm0, %v1402_v11 }
  0xc3   : > { %v414_v12 = vpop.permute.xlu0 %413 }
  0xc7   : > { %v317_v23 = vpop.permute.xlu0 %316 }
 0x119   : > { %v454_v13 = vpop.f32.mrb[0].mxu1  ;;  %v1847_v14 = vpop.f32.mrb[0].mxu0 }
 0x11a   : > { %2243 = vst [vmem:[#allocation11_spill] sm:$0xff] %v1847_v14  ;;  %v456_v15 = vpop.f32.mrb[1].mxu1  ;;  %v455_v16 = vadd.f32 %v454_v13, %v414_v12  ;;  %v1849_v17 = vpop.f32.mrb[1].mxu0 }
 0x11b   : > { %2244 = vst [vmem:[#allocation12_spill] sm:$0xff] %v1849_v17  ;;  %v458_v18 = vpop.f32.mrb[2].mxu1  ;;  %v1851_v19 = vpop.f32.mrb[2].mxu0  ;;  %v457_v33 = vadd.f32 %v456_v15, %v414_v12 }
 0x11c   : > { %2245 = vst [vmem:[#allocation13_spill] sm:$0xff] %v1851_v19  ;;  %v459_v20 = vpop.f32.mrb[3].mxu1  ;;  %v461_v21 = vpack.c.bf16 %v455_v16, %v455_v16  ;;  %v1853_v22 = vpop.f32.mrb[3].mxu0 }
 0x11d   : > { %2246 = vst [vmem:[#allocation14_spill] sm:$0xff] %v1853_v22  ;;  %v462_v34 = vpack.c.bf16 %v457_v33, %v457_v33 }
 0x11e   : > { %464 = vxpose.xlu1.c.b16.start.end [1/1] (short) %v461_v21, 128 }
 0x121   : > { %v378_v24 = vpop.f32.mrb[4].mxu0 }
 0x122   : > { %v379_v25 = vadd.f32 %v378_v24, %v317_v23  ;;  %v380_v26 = vpop.f32.mrb[5].mxu0 }
 0x123   : > { %v381_v27 = vadd.f32 %v380_v26, %v317_v23  ;;  %v382_v28 = vpop.f32.mrb[6].mxu0 }
 0x124   : > { %v1329_v29 = vpack.c.bf16 %v379_v25, %v379_v25  ;;  %v383_v30 = vpop.f32.mrb[7].mxu0 }
 0x125   : > { %v1330_v31 = vpack.c.bf16 %v381_v27, %v381_v27 }
 0x126   : > { %v552_v32 = vsel %vm550_vm1, %v1329_v29, 0 }
 0x127   : > { %1304 = vmatprep.subr.msk.bf16.mxu1 %vm550_vm1, %v1330_v31 }
 0x128   : > { %558 = vmatpush1.bf16.msra.mxu1 %v552_v32 }
 0x13b   : > { %480 = vxpose.xlu1.c.b16.start.end [1/1] (short) %v462_v34, 128 }
 0x13f   : > { %1400 = vset.pattern.permute.xlu1 %v1656_v0 }
 0x184   : > { %v472_v35 = vpop.trf.xlu1 }
 0x185   : > { %1305 = vmatmul.mubr.msk.bf16.vlgmr.msra.gmra.mrb[4].mxu1 %vm501_vm2, %v472_v35 }
 0x186   : > { %599 = vmatprep.mubr.bf16.mxu1 %v1656_v0 }
 0x188   : > { %v473_v36 = vpop.trf.xlu1 }
 0x18c   : > { %v474_v37 = vpop.trf.xlu1 }
 0x18d   : > { %1306 = vmatmul.mubr.msk.bf16.gmra.mrb[8].mxu1 %vm501_vm2, %v473_v36 }
 0x18e   : > { %609 = vmatprep.mubr.bf16.mxu1 %v1656_v0 }
 0x190   : > { %v475_v38 = vpop.trf.xlu1 }
 0x194   : > { %v476_v39 = vpop.trf.xlu1 }
 0x195   : > { %1307 = vmatmul.mubr.msk.bf16.gmra.mrb[12].mxu1 %vm501_vm2, %v474_v37 }
 0x196   : > { %619 = vmatprep.mubr.bf16.mxu1 %v1656_v0 }
 0x198   : > { %v477_v40 = vpop.trf.xlu1 }
 0x19c   : > { %v478_v41 = vpop.trf.xlu1 }
 0x19d   : > { %1308 = vmatmul.mubr.msk.bf16.gmra.mrb[16].mxu1 %vm501_vm2, %v475_v38 }
 0x19e   : > { %629 = vmatprep.mubr.bf16.mxu1 %v1656_v0 }
 0x1a0   : > { %v479_v42 = vpop.trf.xlu1 }
 0x1a4   : > { %v488_v43 = vpop.trf.xlu1 }
 0x1a5   : > { %1309 = vmatmul.mubr.msk.bf16.gmra.mrb[20].mxu1 %vm501_vm2, %v476_v39 }
 0x1a6   : > { %639 = vmatprep.mubr.bf16.mxu1 %v1656_v0 }
 0x1a8   : > { %v489_v44 = vpop.trf.xlu1 }
 0x1ac   : > { %v490_v45 = vpop.trf.xlu1 }
 0x1ad   : > { %1310 = vmatmul.mubr.msk.bf16.gmra.mrb[24].mxu1 %vm501_vm2, %v477_v40 }
 0x1ae   : > { %649 = vmatprep.mubr.bf16.mxu1 %v1656_v0 }
 0x1b0   : > { %v491_v46 = vpop.trf.xlu1 }
 0x1b4   : > { %v492_v47 = vpop.trf.xlu1 }
 0x1b5   : > { %1311 = vmatmul.mubr.msk.bf16.gmra.mrb[28].mxu1 %vm501_vm2, %v478_v41 }
 0x1b6   : > { %659 = vmatprep.mubr.bf16.mxu1 %v1656_v0 }
 0x1b8   : > { %v493_v48 = vpop.trf.xlu1 }
 0x1bc   : > { %v494_v49 = vpop.trf.xlu1 }
 0x1bd   : > { %1312 = vmatmul.mubr.msk.bf16.gmra.mrb[32].mxu1 %vm501_vm2, %v479_v42 }
 0x1be   : > { %669 = vmatprep.mubr.bf16.mxu1 %v1656_v0 }
 0x1c0   : > { %v495_v50 = vpop.trf.xlu1 }
 0x1c5   : > { %1313 = vmatmul.mubr.msk.bf16.gmra.mrb[36].mxu1 %vm501_vm2, %v488_v43 }
 0x1c6   : > { %679 = vmatprep.mubr.bf16.mxu1 %v1656_v0 }
 0x1cd   : > { %1314 = vmatmul.mubr.msk.bf16.gmra.mrb[40].mxu1 %vm501_vm2, %v489_v44 }
 0x1ce   : > { %689 = vmatprep.mubr.bf16.mxu1 %v1656_v0 }
 0x1d5   : > { %1315 = vmatmul.mubr.msk.bf16.gmra.mrb[44].mxu1 %vm501_vm2, %v490_v45 }
 0x1d6   : > { %699 = vmatprep.mubr.bf16.mxu1 %v1656_v0 }
 0x1dd   : > { %1316 = vmatmul.mubr.msk.bf16.gmra.mrb[48].mxu1 %vm501_vm2, %v491_v46 }
 0x1de   : > { %709 = vmatprep.mubr.bf16.mxu1 %v1656_v0 }
 0x1e5   : > { %1317 = vmatmul.mubr.msk.bf16.gmra.mrb[52].mxu1 %vm501_vm2, %v492_v47 }
 0x1e6   : > { %719 = vmatprep.mubr.bf16.mxu1 %v1656_v0 }
 0x1ed   : > { %1318 = vmatmul.mubr.msk.bf16.gmra.mrb[56].mxu1 %vm501_vm2, %v493_v48 }
 0x1ee   : > { %729 = vmatprep.mubr.bf16.mxu1 %v1656_v0 }
 0x1f5   : > { %1319 = vmatmul.mubr.msk.bf16.gmra.mrb[60].mxu1 %vm501_vm2, %v494_v49 }
 0x1f6   : > { %739 = vmatprep.mubr.bf16.mxu1 %v1656_v0 }
 0x1fd   : > { %1320 = vmatmul.mubr.msk.bf16.gmra.mrb[64].mxu1 %vm501_vm2, %v495_v50 }
 0x258   : > { %v1887_v51 = vpop.f32.mrb[4].mxu1 }
 0x259   : > { %v1889_v52 = vpop.f32.mrb[5].mxu1 }
 0x25a   : > { %v1891_v53 = vpop.f32.mrb[6].mxu1  ;;  %v750_v54 = vmax.f32 %v1887_v51, %v1889_v52 }
 0x25b   : > { %v1895_v55 = vpop.f32.mrb[7].mxu1 }
 0x25c   : > { %751 = vmax.xlane.f32.xlu0 %v750_v54  ;;  %v753_v56 = vmax.f32 %v1891_v53, %v1895_v55 }
 0x25e   : > { %754 = vmax.xlane.f32.xlu1 %v753_v56 }
 0x260   : > { %v1899_v57 = vpop.f32.mrb[8].mxu1 }
 0x261   : > { %v1901_v58 = vpop.f32.mrb[9].mxu1 }
 0x262   : > { %v1903_v59 = vpop.f32.mrb[10].mxu1  ;;  %v756_v60 = vmax.f32 %v1899_v57, %v1901_v58 }
 0x263   : > { %v1907_v61 = vpop.f32.mrb[11].mxu1 }
 0x264   : > { %757 = vmax.xlane.f32.xlu0 %v756_v60  ;;  %v759_v62 = vmax.f32 %v1903_v59, %v1907_v61 }
 0x268   : > { %760 = vmax.xlane.f32.xlu0 %v759_v62  ;;  %v1911_v63 = vpop.f32.mrb[12].mxu1 }
 0x269   : > { %v1913_v0 = vpop.f32.mrb[13].mxu1 }
 0x26a   : > { %v1915_v1 = vpop.f32.mrb[14].mxu1  ;;  %v762_v2 = vmax.f32 %v1911_v63, %v1913_v0 }
 0x26b   : > { %v1919_v3 = vpop.f32.mrb[15].mxu1 }
 0x26c   : > { %763 = vmax.xlane.f32.xlu0 %v762_v2  ;;  %v765_v4 = vmax.f32 %v1915_v1, %v1919_v3 }
 0x270   : > { %766 = vmax.xlane.f32.xlu0 %v765_v4  ;;  %v1923_v5 = vpop.f32.mrb[16].mxu1 }
 0x271   : > { %v1925_v6 = vpop.f32.mrb[17].mxu1 }
 0x272   : > { %v1927_v7 = vpop.f32.mrb[18].mxu1  ;;  %v768_v8 = vmax.f32 %v1923_v5, %v1925_v6 }
 0x273   : > { %v1931_v9 = vpop.f32.mrb[19].mxu1 }
 0x274   : > { %769 = vmax.xlane.f32.xlu0 %v768_v8  ;;  %v771_v10 = vmax.f32 %v1927_v7, %v1931_v9 }
 0x278   : > { %772 = vmax.xlane.f32.xlu0 %v771_v10  ;;  %v1935_v11 = vpop.f32.mrb[20].mxu1 }
 0x279   : > { %v1937_v12 = vpop.f32.mrb[21].mxu1 }
 0x27a   : > { %v1939_v13 = vpop.f32.mrb[22].mxu1  ;;  %v774_v15 = vmax.f32 %v1935_v11, %v1937_v12 }
 0x27b   : > { %v1943_v16 = vpop.f32.mrb[23].mxu1 }
 0x27c   : > { %775 = vmax.xlane.f32.xlu0 %v774_v15  ;;  %v777_v18 = vmax.f32 %v1939_v13, %v1943_v16 }
 0x280   : > { %778 = vmax.xlane.f32.xlu0 %v777_v18  ;;  %v1947_v20 = vpop.f32.mrb[24].mxu1 }
 0x281   : > { %v1949_v21 = vpop.f32.mrb[25].mxu1 }
 0x282   : > { %v1951_v23 = vpop.f32.mrb[26].mxu1  ;;  %v780_v24 = vmax.f32 %v1947_v20, %v1949_v21 }
 0x283   : > { %v1955_v25 = vpop.f32.mrb[27].mxu1 }
 0x284   : > { %781 = vmax.xlane.f32.xlu0 %v780_v24  ;;  %v783_v26 = vmax.f32 %v1951_v23, %v1955_v25 }
 0x286   : > { %784 = vmax.xlane.f32.xlu1 %v783_v26 }
 0x288   : > { %v1959_v27 = vpop.f32.mrb[28].mxu1 }
 0x289   : > { %v1961_v28 = vpop.f32.mrb[29].mxu1 }
 0x28a   : > { %v1963_v29 = vpop.f32.mrb[30].mxu1  ;;  %v786_v30 = vmax.f32 %v1959_v27, %v1961_v28 }
 0x28b   : > { %v1967_v31 = vpop.f32.mrb[31].mxu1 }
 0x28c   : > { %787 = vmax.xlane.f32.xlu0 %v786_v30  ;;  %v789_v32 = vmax.f32 %v1963_v29, %v1967_v31 }
 0x28e   : > { %790 = vmax.xlane.f32.xlu1 %v789_v32 }
 0x290   : > { %v1971_v33 = vpop.f32.mrb[32].mxu1 }
 0x291   : > { %v1973_v34 = vpop.f32.mrb[33].mxu1 }
 0x292   : > { %v1975_v35 = vpop.f32.mrb[34].mxu1  ;;  %v792_v36 = vmax.f32 %v1971_v33, %v1973_v34 }
 0x293   : > { %v1979_v37 = vpop.f32.mrb[35].mxu1 }
 0x294   : > { %793 = vmax.xlane.f32.xlu0 %v792_v36  ;;  %v795_v38 = vmax.f32 %v1975_v35, %v1979_v37 }
 0x296   : > { %796 = vmax.xlane.f32.xlu1 %v795_v38 }
 0x298   : > { %v1983_v39 = vpop.f32.mrb[36].mxu1 }
 0x299   : > { %v1985_v40 = vpop.f32.mrb[37].mxu1 }
 0x29a   : > { %v1987_v41 = vpop.f32.mrb[38].mxu1  ;;  %v798_v42 = vmax.f32 %v1983_v39, %v1985_v40 }
 0x29b   : > { %v1991_v43 = vpop.f32.mrb[39].mxu1 }
 0x29c   : > { %799 = vmax.xlane.f32.xlu0 %v798_v42  ;;  %v801_v44 = vmax.f32 %v1987_v41, %v1991_v43 }
 0x29e   : > { %802 = vmax.xlane.f32.xlu1 %v801_v44 }
 0x2a0   : > { %v1995_v45 = vpop.f32.mrb[40].mxu1 }
 0x2a1   : > { %v1997_v46 = vpop.f32.mrb[41].mxu1 }
 0x2a2   : > { %v1999_v47 = vpop.f32.mrb[42].mxu1  ;;  %v804_v48 = vmax.f32 %v1995_v45, %v1997_v46 }
 0x2a3   : > { %v2003_v49 = vpop.f32.mrb[43].mxu1 }
 0x2a4   : > { %805 = vmax.xlane.f32.xlu0 %v804_v48  ;;  %v807_v50 = vmax.f32 %v1999_v47, %v2003_v49 }
 0x2a6   : > { %808 = vmax.xlane.f32.xlu1 %v807_v50 }
 0x2a8   : > { %v2007_v54 = vpop.f32.mrb[44].mxu1 }
 0x2a9   : > { %v2009_v56 = vpop.f32.mrb[45].mxu1 }
 0x2aa   : > { %v2011_v60 = vpop.f32.mrb[46].mxu1  ;;  %v810_v62 = vmax.f32 %v2007_v54, %v2009_v56 }
 0x2ab   : > { %v2015_v2 = vpop.f32.mrb[47].mxu1 }
 0x2ac   : > { %811 = vmax.xlane.f32.xlu0 %v810_v62  ;;  %v813_v4 = vmax.f32 %v2011_v60, %v2015_v2 }
 0x2ae   : > { %814 = vmax.xlane.f32.xlu1 %v813_v4 }
 0x2b0   : > { %v2019_v8 = vpop.f32.mrb[48].mxu1 }
 0x2b1   : > { %v2021_v10 = vpop.f32.mrb[49].mxu1 }
 0x2b2   : > { %v2023_v15 = vpop.f32.mrb[50].mxu1  ;;  %v816_v18 = vmax.f32 %v2019_v8, %v2021_v10 }
 0x2b3   : > { %v2027_v24 = vpop.f32.mrb[51].mxu1 }
 0x2b4   : > { %817 = vmax.xlane.f32.xlu0 %v816_v18  ;;  %v819_v26 = vmax.f32 %v2023_v15, %v2027_v24 }
 0x2b6   : > { %820 = vmax.xlane.f32.xlu1 %v819_v26 }
 0x2b8   : > { %v2031_v30 = vpop.f32.mrb[52].mxu1 }
 0x2b9   : > { %v2033_v32 = vpop.f32.mrb[53].mxu1 }
 0x2ba   : > { %v2035_v36 = vpop.f32.mrb[54].mxu1  ;;  %v822_v38 = vmax.f32 %v2031_v30, %v2033_v32 }
 0x2bb   : > { %v2039_v42 = vpop.f32.mrb[55].mxu1 }
 0x2bc   : > { %2247 = vst [vmem:[#allocation15_spill] sm:$0xff] %v2039_v42  ;;  %823 = vmax.xlane.f32.xlu0 %v822_v38  ;;  %v825_v44 = vmax.f32 %v2035_v36, %v2039_v42 }
 0x2be   : > { %826 = vmax.xlane.f32.xlu1 %v825_v44 }
 0x2c0   : > { %v2043_v48 = vpop.f32.mrb[56].mxu1 }
 0x2c1   : > { %2248 = vst [vmem:[#allocation16_spill] sm:$0xff] %v2043_v48  ;;  %v2045_v50 = vpop.f32.mrb[57].mxu1 }
 0x2c2   : > { %2249 = vst [vmem:[#allocation17_spill] sm:$0xff] %v2045_v50  ;;  %v2047_v62 = vpop.f32.mrb[58].mxu1  ;;  %v828_v4 = vmax.f32 %v2043_v48, %v2045_v50 }
 0x2c3   : > { %2250 = vst [vmem:[#allocation18_spill] sm:$0xff] %v2047_v62  ;;  %v2051_v18 = vpop.f32.mrb[59].mxu1 }
 0x2c4   : > { %2251 = vst [vmem:[#allocation19_spill] sm:$0xff] %v2051_v18  ;;  %829 = vmax.xlane.f32.xlu0 %v828_v4  ;;  %v831_v26 = vmax.f32 %v2047_v62, %v2051_v18 }
 0x2c6   : > { %832 = vmax.xlane.f32.xlu1 %v831_v26 }
 0x2c8   : > { %v2055_v38 = vpop.f32.mrb[60].mxu1 }
 0x2c9   : > { %2252 = vst [vmem:[#allocation20_spill] sm:$0xff] %v2055_v38  ;;  %v2057_v17 = vpop.f32.mrb[61].mxu1 }
 0x2ca   : > { %2253 = vst [vmem:[#allocation21_spill] sm:$0xff] %v2057_v17  ;;  %v2059_v44 = vpop.f32.mrb[62].mxu1  ;;  %v834_v14 = vmax.f32 %v2055_v38, %v2057_v17 }
 0x2cb   : > { %2254 = vst [vmem:[#allocation22_spill] sm:$0xff] %v2059_v44  ;;  %v2063_v22 = vpop.f32.mrb[63].mxu1 }
 0x2cc   : > { %2255 = vst [vmem:[#allocation23_spill] sm:$0xff] %v2063_v22  ;;  %835 = vmax.xlane.f32.xlu0 %v834_v14  ;;  %v837_v19 = vmax.f32 %v2059_v44, %v2063_v22  ;;  %v302_v14 = vld [vmem:[%s2218_s2 + $0x8] sm:$0xff] }
 0x2ce   : > { %838 = vmax.xlane.f32.xlu1 %v837_v19  ;;  %v301_v19 = vld [vmem:[%s2218_s2] sm:$0xff] }
 0x2d0   : > { %v2067_v4 = vpop.f32.mrb[64].mxu1 }
 0x2d1   : > { %2256 = vst [vmem:[#allocation24_spill] sm:$0xff] %v2067_v4  ;;  %v2069_v18 = vpop.f32.mrb[65].mxu1 }
 0x2d2   : > { %2257 = vst [vmem:[#allocation25_spill] sm:$0xff] %v2069_v18  ;;  %v2071_v26 = vpop.f32.mrb[66].mxu1  ;;  %v840_v62 = vmax.f32 %v2067_v4, %v2069_v18 }
 0x2d3   : > { %2258 = vst [vmem:[#allocation26_spill] sm:$0xff] %v2071_v26  ;;  %v2075_v50 = vpop.f32.mrb[67].mxu1 }
 0x2d4   : > { %2259 = vst [vmem:[#allocation27_spill] sm:$0xff] %v2075_v50  ;;  %841 = vmax.xlane.f32.xlu0 %v840_v62  ;;  %v843_v17 = vmax.f32 %v2071_v26, %v2075_v50 }
 0x2d6   : > { %844 = vmax.xlane.f32.xlu1 %v843_v17 }
 0x2e7   : > { %311 = vperm.xlu1 %1400, %v302_v14  }
 0x2e9   : > { %v752_v22 = vpop.xlane.xlu0 %751 }
 0x2ea   : > { %v846_v44 = vsub.f32 %v1887_v51, %v752_v22  ;;  %v847_v18 = vsub.f32 %v1889_v52, %v752_v22  ;;  %306 = vperm.xlu0 %1399, %v301_v19  }
 0x2eb   : > { %v755_v62 = vpop.xlane.xlu1 %754 }
 0x2ec   : > { %v910_v4 = vmul.f32 1.442695, %v846_v44  ;;  %v912_v38 = vmul.f32 1.442695, %v847_v18  ;;  %v848_v17 = vsub.f32 %v1891_v53, %v755_v62  ;;  %v849_v50 = vsub.f32 %v1895_v55, %v755_v62 }
 0x2ee   : > { %1403 = vpow2.f32 %v910_v4  ;;  %v914_v26 = vmul.f32 1.442695, %v848_v17  ;;  %v916_v14 = vmul.f32 1.442695, %v849_v50 }
 0x2ef   : > { %1405 = vpow2.f32 %v912_v38 }
 0x2f0   : > { %1407 = vpow2.f32 %v914_v26 }
 0x2f1   : > { %1409 = vpow2.f32 %v916_v14  ;;  %v758_v48 = vpop.xlane.xlu0 %757 }
 0x2f2   : > { %v850_v42 = vsub.f32 %v1899_v57, %v758_v48  ;;  %v851_v51 = vsub.f32 %v1901_v58, %v758_v48 }
 0x2f4   : > { %v918_v22 = vmul.f32 1.442695, %v850_v42  ;;  %v920_v52 = vmul.f32 1.442695, %v851_v51  ;;  %v1657_v42 = vmov 1065369472  }
 0x2f5   : > { %v761_v19 = vpop.xlane.xlu0 %760  ;;  %1102 = vmatprep.mubr.bf16.mxu0 %v1657_v42 }
 0x2f6   : > { %v852_v18 = vsub.f32 %v1903_v59, %v761_v19  ;;  %v853_v53 = vsub.f32 %v1907_v61, %v761_v19  ;;  %1411 = vpow2.f32 %v918_v22 }
 0x2f7   : > { %1413 = vpow2.f32 %v920_v52 }
 0x2f8   : > { %v1404_v44 = vpop.eup %1403  ;;  %v922_v55 = vmul.f32 1.442695, %v852_v18  ;;  %v924_v4 = vmul.f32 1.442695, %v853_v53 }
 0x2f9   : > { %v1406_v50 = vpop.eup %1405  ;;  %v764_v38 = vpop.xlane.xlu0 %763 }
 0x2fa   : > { %v1408_v26 = vpop.eup %1407  ;;  %1415 = vpow2.f32 %v922_v55  ;;  %v854_v57 = vsub.f32 %v1911_v63, %v764_v38  ;;  %v855_v58 = vsub.f32 %v1913_v0, %v764_v38 }
 0x2fb   : > { %v1410_v48 = vpop.eup %1409  ;;  %1417 = vpow2.f32 %v924_v4  ;;  %v1038_v59 = vpack.c.bf16 %v1408_v26, %v1404_v44 }
 0x2fc   : > { %v926_v61 = vmul.f32 1.442695, %v854_v57  ;;  %v1039_v62 = vpack.c.bf16 %v1410_v48, %v1406_v50  ;;  %v928_v17 = vmul.f32 1.442695, %v855_v58 }
 0x2fd   : > { %v767_v14 = vpop.xlane.xlu0 %766 }
 0x2fe   : > { %1070 = vmatprep.subr.bf16.mxu0 %v1039_v62  ;;  %1113 = vmatprep.subr.bf16.mxu1 %v1039_v62  ;;  %v856_v51 = vsub.f32 %v1915_v1, %v767_v14  ;;  %v857_v22 = vsub.f32 %v1919_v3, %v767_v14  ;;  %1419 = vpow2.f32 %v926_v61 }
 0x2ff   : > { %1071 = vmatpush1.bf16.xpose.msra.mxu0 %v1038_v59  ;;  %1114 = vmatpush1.bf16.xpose.msra.mxu1 %v1038_v59  ;;  %1421 = vpow2.f32 %v928_v17 }
 0x300   : > { %v930_v63 = vmul.f32 1.442695, %v856_v51  ;;  %v932_v0 = vmul.f32 1.442695, %v857_v22  ;;  %v1412_v19 = vpop.eup %1411 }
 0x301   : > { %v770_v52 = vpop.xlane.xlu0 %769  ;;  %v1414_v44 = vpop.eup %1413 }
 0x302   : > { %1423 = vpow2.f32 %v930_v63  ;;  %v858_v18 = vsub.f32 %v1923_v5, %v770_v52  ;;  %v859_v53 = vsub.f32 %v1925_v6, %v770_v52 }
 0x303   : > { %1425 = vpow2.f32 %v932_v0 }
 0x304   : > { %v1416_v55 = vpop.eup %1415  ;;  %v934_v4 = vmul.f32 1.442695, %v858_v18  ;;  %v936_v50 = vmul.f32 1.442695, %v859_v53 }
 0x305   : > { %v1418_v1 = vpop.eup %1417  ;;  %v773_v3 = vpop.xlane.xlu0 %772  ;;  %v1040_v38 = vpack.c.bf16 %v1416_v55, %v1412_v19 }
 0x306   : > { %v860_v26 = vsub.f32 %v1927_v7, %v773_v3  ;;  %v861_v57 = vsub.f32 %v1931_v9, %v773_v3  ;;  %v1041_v58 = vpack.c.bf16 %v1418_v1, %v1414_v44  ;;  %1427 = vpow2.f32 %v934_v4 }
 0x307   : > { %1429 = vpow2.f32 %v936_v50 }
 0x308   : > { %v938_v48 = vmul.f32 1.442695, %v860_v26  ;;  %v940_v59 = vmul.f32 1.442695, %v861_v57  ;;  %1072 = vmatprep.subr.bf16.mxu0 %v1041_v58  ;;  %1115 = vmatprep.subr.bf16.mxu1 %v1041_v58  ;;  %v1420_v6 = vpop.eup %1419 }
 0x309   : > { %1073 = vmatpush1.bf16.xpose.msra.mxu0 %v1040_v38  ;;  %1116 = vmatpush1.bf16.xpose.msra.mxu1 %v1040_v38  ;;  %v776_v5 = vpop.xlane.xlu0 %775  ;;  %v1422_v17 = vpop.eup %1421 }
 0x30a   : > { %1431 = vpow2.f32 %v938_v48  ;;  %v862_v61 = vsub.f32 %v1935_v11, %v776_v5  ;;  %v863_v62 = vsub.f32 %v1937_v12, %v776_v5 }
 0x30b   : > { %1433 = vpow2.f32 %v940_v59 }
 0x30c   : > { %v1424_v7 = vpop.eup %1423  ;;  %v942_v9 = vmul.f32 1.442695, %v862_v61  ;;  %v944_v51 = vmul.f32 1.442695, %v863_v62 }
 0x30d   : > { %v1426_v14 = vpop.eup %1425  ;;  %v779_v22 = vpop.xlane.xlu0 %778  ;;  %v1042_v63 = vpack.c.bf16 %v1424_v7, %v1420_v6 }
 0x30e   : > { %v864_v0 = vsub.f32 %v1939_v13, %v779_v22  ;;  %v865_v52 = vsub.f32 %v1943_v16, %v779_v22  ;;  %v1043_v19 = vpack.c.bf16 %v1426_v14, %v1422_v17  ;;  %1435 = vpow2.f32 %v942_v9 }
 0x30f   : > { %1437 = vpow2.f32 %v944_v51 }
 0x310   : > { %v946_v18 = vmul.f32 1.442695, %v864_v0  ;;  %v948_v53 = vmul.f32 1.442695, %v865_v52  ;;  %1074 = vmatprep.subr.bf16.mxu0 %v1043_v19  ;;  %1117 = vmatprep.subr.bf16.mxu1 %v1043_v19  ;;  %v1428_v12 = vpop.eup %1427 }
 0x311   : > { %1075 = vmatpush1.bf16.xpose.msra.mxu0 %v1042_v63  ;;  %1118 = vmatpush1.bf16.xpose.msra.mxu1 %v1042_v63  ;;  %v782_v11 = vpop.xlane.xlu0 %781  ;;  %v1430_v4 = vpop.eup %1429 }
 0x312   : > { %1439 = vpow2.f32 %v946_v18  ;;  %v866_v44 = vsub.f32 %v1947_v20, %v782_v11  ;;  %v867_v55 = vsub.f32 %v1949_v21, %v782_v11 }
 0x313   : > { %1441 = vpow2.f32 %v948_v53  ;;  %v785_v13 = vpop.xlane.xlu1 %784 }
 0x314   : > { %v1432_v16 = vpop.eup %1431  ;;  %v950_v1 = vmul.f32 1.442695, %v866_v44  ;;  %v868_v50 = vsub.f32 %v1951_v23, %v785_v13  ;;  %v869_v3 = vsub.f32 %v1955_v25, %v785_v13  ;;  %v952_v57 = vmul.f32 1.442695, %v867_v55 }
 0x315   : > { %v1434_v38 = vpop.eup %1433  ;;  %v1044_v26 = vpack.c.bf16 %v1432_v16, %v1428_v12 }
 0x316   : > { %v954_v58 = vmul.f32 1.442695, %v868_v50  ;;  %v956_v48 = vmul.f32 1.442695, %v869_v3  ;;  %v1045_v59 = vpack.c.bf16 %v1434_v38, %v1430_v4  ;;  %1443 = vpow2.f32 %v950_v1 }
 0x318   : > { %1445 = vpow2.f32 %v954_v58  ;;  %1076 = vmatprep.subr.bf16.mxu0 %v1045_v59  ;;  %1119 = vmatprep.subr.bf16.mxu1 %v1045_v59  ;;  %v1436_v21 = vpop.eup %1435 }
 0x319   : > { %1447 = vpow2.f32 %v956_v48  ;;  %1077 = vmatpush1.bf16.xpose.msra.mxu0 %v1044_v26  ;;  %1120 = vmatpush1.bf16.xpose.msra.mxu1 %v1044_v26  ;;  %v788_v20 = vpop.xlane.xlu0 %787  ;;  %v1438_v5 = vpop.eup %1437 }
 0x31a   : > { %1449 = vpow2.f32 %v952_v57  ;;  %v870_v23 = vsub.f32 %v1959_v27, %v788_v20  ;;  %v871_v25 = vsub.f32 %v1961_v28, %v788_v20 }
 0x31b   : > { %v791_v6 = vpop.xlane.xlu1 %790 }
 0x31c   : > { %v1440_v61 = vpop.eup %1439  ;;  %v958_v62 = vmul.f32 1.442695, %v870_v23  ;;  %v872_v17 = vsub.f32 %v1963_v29, %v791_v6  ;;  %v873_v7 = vsub.f32 %v1967_v31, %v791_v6  ;;  %v960_v51 = vmul.f32 1.442695, %v871_v25 }
 0x31d   : > { %v1442_v9 = vpop.eup %1441  ;;  %v1046_v14 = vpack.c.bf16 %v1440_v61, %v1436_v21 }
 0x31e   : > { %v962_v22 = vmul.f32 1.442695, %v872_v17  ;;  %v964_v63 = vmul.f32 1.442695, %v873_v7  ;;  %v1047_v0 = vpack.c.bf16 %v1442_v9, %v1438_v5  ;;  %1451 = vpow2.f32 %v958_v62 }
 0x320   : > { %1453 = vpow2.f32 %v962_v22  ;;  %1078 = vmatprep.subr.bf16.mxu0 %v1047_v0  ;;  %1121 = vmatprep.subr.bf16.mxu1 %v1047_v0  ;;  %v1444_v27 = vpop.eup %1443 }
 0x321   : > { %1455 = vpow2.f32 %v964_v63  ;;  %1079 = vmatpush1.bf16.xpose.msra.mxu0 %v1046_v14  ;;  %1122 = vmatpush1.bf16.xpose.msra.mxu1 %v1046_v14  ;;  %v794_v28 = vpop.xlane.xlu0 %793 }
 0x322   : > { %v1446_v52 = vpop.eup %1445  ;;  %1457 = vpow2.f32 %v960_v51  ;;  %v874_v29 = vsub.f32 %v1971_v33, %v794_v28  ;;  %v875_v31 = vsub.f32 %v1973_v34, %v794_v28 }
 0x323   : > { %v1448_v19 = vpop.eup %1447  ;;  %v797_v18 = vpop.xlane.xlu1 %796  ;;  %v1048_v53 = vpack.c.bf16 %v1446_v52, %v1444_v27 }
 0x324   : > { %v1450_v11 = vpop.eup %1449  ;;  %v966_v12 = vmul.f32 1.442695, %v874_v29  ;;  %v876_v44 = vsub.f32 %v1975_v35, %v797_v18  ;;  %v877_v55 = vsub.f32 %v1979_v37, %v797_v18  ;;  %v968_v13 = vmul.f32 1.442695, %v875_v31 }
 0x325   : > { %v1049_v4 = vpack.c.bf16 %v1448_v19, %v1450_v11 }
 0x326   : > { %v970_v16 = vmul.f32 1.442695, %v876_v44  ;;  %v972_v1 = vmul.f32 1.442695, %v877_v55  ;;  %1459 = vpow2.f32 %v966_v12 }
 0x327   : > { %1080 = vmatprep.subr.bf16.mxu0 %v1049_v4  ;;  %1123 = vmatprep.subr.bf16.mxu1 %v1049_v4 }
 0x328   : > { %1461 = vpow2.f32 %v970_v16  ;;  %v1452_v33 = vpop.eup %1451 }
 0x329   : > { %1463 = vpow2.f32 %v972_v1  ;;  %1081 = vmatpush1.bf16.xpose.msra.mxu0 %v1048_v53  ;;  %1124 = vmatpush1.bf16.xpose.msra.mxu1 %v1048_v53  ;;  %v800_v34 = vpop.xlane.xlu0 %799 }
 0x32a   : > { %v1454_v50 = vpop.eup %1453  ;;  %1465 = vpow2.f32 %v968_v13  ;;  %v878_v3 = vsub.f32 %v1983_v39, %v800_v34  ;;  %v879_v35 = vsub.f32 %v1985_v40, %v800_v34 }
 0x32b   : > { %v1456_v37 = vpop.eup %1455  ;;  %v803_v38 = vpop.xlane.xlu1 %802  ;;  %v1050_v26 = vpack.c.bf16 %v1454_v50, %v1452_v33 }
 0x32c   : > { %v1458_v57 = vpop.eup %1457  ;;  %v974_v58 = vmul.f32 1.442695, %v878_v3  ;;  %v880_v48 = vsub.f32 %v1987_v41, %v803_v38  ;;  %v881_v59 = vsub.f32 %v1991_v43, %v803_v38  ;;  %v976_v21 = vmul.f32 1.442695, %v879_v35 }
 0x32d   : > { %v1051_v20 = vpack.c.bf16 %v1456_v37, %v1458_v57 }
 0x32e   : > { %v978_v23 = vmul.f32 1.442695, %v880_v48  ;;  %v980_v25 = vmul.f32 1.442695, %v881_v59  ;;  %1467 = vpow2.f32 %v974_v58 }
 0x32f   : > { %1082 = vmatprep.subr.bf16.mxu0 %v1051_v20  ;;  %1125 = vmatprep.subr.bf16.mxu1 %v1051_v20 }
 0x330   : > { %1469 = vpow2.f32 %v978_v23  ;;  %v1460_v39 = vpop.eup %1459 }
 0x331   : > { %1471 = vpow2.f32 %v980_v25  ;;  %1083 = vmatpush1.bf16.xpose.msra.mxu0 %v1050_v26  ;;  %1126 = vmatpush1.bf16.xpose.msra.mxu1 %v1050_v26  ;;  %v806_v40 = vpop.xlane.xlu0 %805  ;;  %v2260_v25 = vld [vmem:[#allocation15_spill] sm:$0xff] }
 0x332   : > { %v1462_v5 = vpop.eup %1461  ;;  %1473 = vpow2.f32 %v976_v21  ;;  %v882_v6 = vsub.f32 %v1995_v45, %v806_v40  ;;  %v883_v41 = vsub.f32 %v1997_v46, %v806_v40 }
 0x333   : > { %v1464_v43 = vpop.eup %1463  ;;  %v809_v61 = vpop.xlane.xlu1 %808  ;;  %v1052_v62 = vpack.c.bf16 %v1462_v5, %v1460_v39 }
 0x334   : > { %v1466_v17 = vpop.eup %1465  ;;  %v982_v7 = vmul.f32 1.442695, %v882_v6  ;;  %v884_v9 = vsub.f32 %v1999_v47, %v809_v61  ;;  %v885_v14 = vsub.f32 %v2003_v49, %v809_v61  ;;  %v984_v22 = vmul.f32 1.442695, %v883_v41  ;;  %v2261_v61 = vld [vmem:[#allocation16_spill] sm:$0xff] }
 0x335   : > { %v1053_v51 = vpack.c.bf16 %v1464_v43, %v1466_v17 }
 0x336   : > { %v986_v63 = vmul.f32 1.442695, %v884_v9  ;;  %v988_v0 = vmul.f32 1.442695, %v885_v14  ;;  %1475 = vpow2.f32 %v982_v7 }
 0x337   : > { %1084 = vmatprep.subr.bf16.mxu0 %v1053_v51  ;;  %1127 = vmatprep.subr.bf16.mxu1 %v1053_v51 }
 0x338   : > { %1477 = vpow2.f32 %v986_v63  ;;  %v1468_v45 = vpop.eup %1467  ;;  %v2263_v63 = vld [vmem:[#allocation18_spill] sm:$0xff] }
 0x339   : > { %1479 = vpow2.f32 %v988_v0  ;;  %1085 = vmatpush1.bf16.xpose.msra.mxu0 %v1052_v62  ;;  %1128 = vmatpush1.bf16.xpose.msra.mxu1 %v1052_v62  ;;  %v812_v46 = vpop.xlane.xlu0 %811 }
 0x33a   : > { %v1470_v27 = vpop.eup %1469  ;;  %1481 = vpow2.f32 %v984_v22  ;;  %v886_v28 = vsub.f32 %v2007_v54, %v812_v46  ;;  %v887_v47 = vsub.f32 %v2009_v56, %v812_v46 }
 0x33b   : > { %v1472_v49 = vpop.eup %1471  ;;  %v815_v52 = vpop.xlane.xlu1 %814  ;;  %v1054_v29 = vpack.c.bf16 %v1470_v27, %v1468_v45  ;;  %v2264_v45 = vld [vmem:[#allocation19_spill] sm:$0xff] }
 0x33c   : > { %v1474_v31 = vpop.eup %1473  ;;  %v990_v19 = vmul.f32 1.442695, %v886_v28  ;;  %v888_v18 = vsub.f32 %v2011_v60, %v815_v52  ;;  %v889_v53 = vsub.f32 %v2015_v2, %v815_v52  ;;  %v992_v12 = vmul.f32 1.442695, %v887_v47 }
 0x33d   : > { %v1055_v11 = vpack.c.bf16 %v1472_v49, %v1474_v31 }
 0x33e   : > { %v994_v44 = vmul.f32 1.442695, %v888_v18  ;;  %v996_v55 = vmul.f32 1.442695, %v889_v53  ;;  %1483 = vpow2.f32 %v990_v19  ;;  %v2265_v19 = vld [vmem:[#allocation20_spill] sm:$0xff]  ;;  %v2266_v53 = vld [vmem:[#allocation21_spill] sm:$0xff] }
 0x33f   : > { %1086 = vmatprep.subr.bf16.mxu0 %v1055_v11  ;;  %1129 = vmatprep.subr.bf16.mxu1 %v1055_v11 }
 0x340   : > { %1485 = vpow2.f32 %v994_v44  ;;  %v1476_v54 = vpop.eup %1475 }
 0x341   : > { %1487 = vpow2.f32 %v996_v55  ;;  %1087 = vmatpush1.bf16.xpose.msra.mxu0 %v1054_v29  ;;  %1130 = vmatpush1.bf16.xpose.msra.mxu1 %v1054_v29  ;;  %v818_v56 = vpop.xlane.xlu0 %817 }
 0x342   : > { %v1478_v4 = vpop.eup %1477  ;;  %1489 = vpow2.f32 %v992_v12  ;;  %v890_v13 = vsub.f32 %v2019_v8, %v818_v56  ;;  %v891_v60 = vsub.f32 %v2021_v10, %v818_v56 }
 0x343   : > { %v1480_v2 = vpop.eup %1479  ;;  %v821_v16 = vpop.xlane.xlu1 %820  ;;  %v1056_v1 = vpack.c.bf16 %v1478_v4, %v1476_v54 }
 0x344   : > { %v1482_v33 = vpop.eup %1481  ;;  %v998_v34 = vmul.f32 1.442695, %v890_v13  ;;  %v892_v50 = vsub.f32 %v2023_v15, %v821_v16  ;;  %v893_v3 = vsub.f32 %v2027_v24, %v821_v16  ;;  %v1000_v37 = vmul.f32 1.442695, %v891_v60  ;;  %v2267_v13 = vld [vmem:[#allocation22_spill] sm:$0xff] }
 0x345   : > { %v1057_v35 = vpack.c.bf16 %v1480_v2, %v1482_v33  ;;  %v2268_v2 = vld [vmem:[#allocation23_spill] sm:$0xff] }
 0x346   : > { %v1002_v38 = vmul.f32 1.442695, %v892_v50  ;;  %v1004_v26 = vmul.f32 1.442695, %v893_v3  ;;  %1491 = vpow2.f32 %v998_v34 }
 0x347   : > { %1088 = vmatprep.subr.bf16.mxu0 %v1057_v35  ;;  %1131 = vmatprep.subr.bf16.mxu1 %v1057_v35 }
 0x348   : > { %1493 = vpow2.f32 %v1002_v38  ;;  %v1484_v8 = vpop.eup %1483 }
 0x349   : > { %1495 = vpow2.f32 %v1004_v26  ;;  %1089 = vmatpush1.bf16.xpose.msra.mxu0 %v1056_v1  ;;  %1132 = vmatpush1.bf16.xpose.msra.mxu1 %v1056_v1  ;;  %v824_v10 = vpop.xlane.xlu0 %823  ;;  %v2270_v26 = vld [vmem:[#allocation25_spill] sm:$0xff] }
 0x34a   : > { %v1486_v57 = vpop.eup %1485  ;;  %1497 = vpow2.f32 %v1000_v37  ;;  %v894_v58 = vsub.f32 %v2031_v30, %v824_v10  ;;  %v895_v15 = vsub.f32 %v2033_v32, %v824_v10  ;;  %v2269_v37 = vld [vmem:[#allocation24_spill] sm:$0xff] }
 0x34b   : > { %v1488_v24 = vpop.eup %1487  ;;  %v827_v48 = vpop.xlane.xlu1 %826  ;;  %v1058_v59 = vpack.c.bf16 %v1486_v57, %v1484_v8 }
 0x34c   : > { %v1490_v20 = vpop.eup %1489  ;;  %v1006_v21 = vmul.f32 1.442695, %v894_v58  ;;  %v896_v23 = vsub.f32 %v2035_v36, %v827_v48  ;;  %v897_v39 = vsub.f32 %v2260_v25, %v827_v48  ;;  %v1008_v5 = vmul.f32 1.442695, %v895_v15  ;;  %v2262_v36 = vld [vmem:[#allocation17_spill] sm:$0xff] }
 0x34d   : > { %v1059_v40 = vpack.c.bf16 %v1488_v24, %v1490_v20 }
 0x34e   : > { %v1010_v6 = vmul.f32 1.442695, %v896_v23  ;;  %v1012_v41 = vmul.f32 1.442695, %v897_v39  ;;  %1499 = vpow2.f32 %v1006_v21  ;;  %v2272_v21 = vld [vmem:[#allocation27_spill] sm:$0xff] }
 0x34f   : > { %1090 = vmatprep.subr.bf16.mxu0 %v1059_v40  ;;  %1133 = vmatprep.subr.bf16.mxu1 %v1059_v40 }
 0x350   : > { %1501 = vpow2.f32 %v1010_v6  ;;  %v1492_v30 = vpop.eup %1491 }
 0x351   : > { %1503 = vpow2.f32 %v1012_v41  ;;  %1091 = vmatpush1.bf16.xpose.msra.mxu0 %v1058_v59  ;;  %1134 = vmatpush1.bf16.xpose.msra.mxu1 %v1058_v59  ;;  %v830_v32 = vpop.xlane.xlu0 %829  ;;  %v2271_v59 = vld [vmem:[#allocation26_spill] sm:$0xff] }
 0x352   : > { %v1494_v43 = vpop.eup %1493  ;;  %1505 = vpow2.f32 %v1008_v5  ;;  %v898_v62 = vsub.f32 %v2261_v61, %v830_v32  ;;  %v899_v17 = vsub.f32 %v2262_v36, %v830_v32 }
 0x353   : > { %v1496_v7 = vpop.eup %1495  ;;  %v833_v9 = vpop.xlane.xlu1 %832  ;;  %v1060_v14 = vpack.c.bf16 %v1494_v43, %v1492_v30  ;;  %v2273_v43 = vld [vmem:[#allocation13_spill] sm:$0xff] }
 0x354   : > { %v1498_v51 = vpop.eup %1497  ;;  %v1014_v22 = vmul.f32 1.442695, %v898_v62  ;;  %v900_v0 = vsub.f32 %v2263_v63, %v833_v9  ;;  %v901_v46 = vsub.f32 %v2264_v45, %v833_v9  ;;  %v1016_v28 = vmul.f32 1.442695, %v899_v17  ;;  %v2274_v62 = vld [vmem:[#allocation14_spill] sm:$0xff]  ;;  %v2275_v17 = vld [vmem:[#allocation11_spill] sm:$0xff] }
 0x355   : > { %v1061_v27 = vpack.c.bf16 %v1496_v7, %v1498_v51  ;;  %v2276_v9 = vld [vmem:[#allocation12_spill] sm:$0xff] }
 0x356   : > { %v1018_v47 = vmul.f32 1.442695, %v900_v0  ;;  %v1020_v49 = vmul.f32 1.442695, %v901_v46  ;;  %1507 = vpow2.f32 %v1014_v22 }
 0x357   : > { %1092 = vmatprep.subr.bf16.mxu0 %v1061_v27  ;;  %1135 = vmatprep.subr.bf16.mxu1 %v1061_v27 }
 0x358   : > { %1509 = vpow2.f32 %v1018_v47  ;;  %v1500_v52 = vpop.eup %1499 }
 0x359   : > { %1511 = vpow2.f32 %v1020_v49  ;;  %1093 = vmatpush1.bf16.xpose.msra.mxu0 %v1060_v14  ;;  %1136 = vmatpush1.bf16.xpose.msra.mxu1 %v1060_v14  ;;  %v836_v29 = vpop.xlane.xlu0 %835 }
 0x35a   : > { %v1502_v31 = vpop.eup %1501  ;;  %1513 = vpow2.f32 %v1016_v28  ;;  %v902_v18 = vsub.f32 %v2265_v19, %v836_v29  ;;  %v903_v11 = vsub.f32 %v2266_v53, %v836_v29  ;;  %v1159_v19 = vlaneseq }
 0x35b   : > { %v1504_v12 = vpop.eup %1503  ;;  %v839_v44 = vpop.xlane.xlu1 %838  ;;  %v1062_v55 = vpack.c.bf16 %v1502_v31, %v1500_v52 }
 0x35c   : > { %v1506_v54 = vpop.eup %1505  ;;  %v1022_v56 = vmul.f32 1.442695, %v902_v18  ;;  %v1024_v4 = vmul.f32 1.442695, %v903_v11  ;;  %v904_v60 = vsub.f32 %v2267_v13, %v839_v44  ;;  %v905_v16 = vsub.f32 %v2268_v2, %v839_v44 }
 0x35d   : > { %v1063_v1 = vpack.c.bf16 %v1504_v12, %v1506_v54  ;;  %v1160_v54 = vshrl.u32 %v1159_v19, 7 }
 0x35e   : > { %1515 = vpow2.f32 %v1022_v56  ;;  %v1026_v33 = vmul.f32 1.442695, %v904_v60  ;;  %v1028_v34 = vmul.f32 1.442695, %v905_v16  ;;  %v1171_v60 = vstv %s1158_s21 }
 0x35f   : > { %1517 = vpow2.f32 %v1024_v4  ;;  %1094 = vmatprep.subr.bf16.mxu0 %v1063_v1  ;;  %1137 = vmatprep.subr.bf16.mxu1 %v1063_v1  ;;  %v1161_v56 = vsub.s32 0, %v1160_v54 }
 0x360   : > { %1519 = vpow2.f32 %v1026_v33  ;;  %v1508_v50 = vpop.eup %1507 }
 0x361   : > { %1521 = vpow2.f32 %v1028_v34  ;;  %1095 = vmatpush1.bf16.xpose.msra.mxu0 %v1062_v55  ;;  %1138 = vmatpush1.bf16.xpose.msra.mxu1 %v1062_v55  ;;  %v842_v3 = vpop.xlane.xlu0 %841 }
 0x362   : > { %v1510_v35 = vpop.eup %1509  ;;  %v906_v38 = vsub.f32 %v2269_v37, %v842_v3  ;;  %v907_v8 = vsub.f32 %v2270_v26, %v842_v3 }
 0x363   : > { %v1512_v10 = vpop.eup %1511  ;;  %v845_v57 = vpop.xlane.xlu1 %844  ;;  %v1064_v58 = vpack.c.bf16 %v1510_v35, %v1508_v50 }
 0x364   : > { %v1514_v15 = vpop.eup %1513  ;;  %v1030_v24 = vmul.f32 1.442695, %v906_v38  ;;  %v1032_v48 = vmul.f32 1.442695, %v907_v8  ;;  %v908_v20 = vsub.f32 %v2271_v59, %v845_v57  ;;  %v909_v23 = vsub.f32 %v2272_v21, %v845_v57  ;;  %v1535_v38 = vld [vmem:[%s1817_s16] sm:$0xff]  ;;  %v1536_v8 = vld [vmem:[%s1817_s16 + $0x10] sm:$0xff] }
 0x365   : > { %v1065_v25 = vpack.c.bf16 %v1512_v10, %v1514_v15  ;;  %v1537_v57 = vld [vmem:[%s1817_s16 + $0x8] sm:$0xff]  ;;  %v1538_v15 = vld [vmem:[%s1817_s16 + $0x18] sm:$0xff]  ;;  %s1575_s16 = scalar_lea.vmem %s1574_s7, 1024 }
 0x366   : > { %1523 = vpow2.f32 %v1030_v24  ;;  %v1034_v39 = vmul.f32 1.442695, %v908_v20  ;;  %v1036_v40 = vmul.f32 1.442695, %v909_v23  ;;  %p1577_p13 = scmp.lt.s32.totalorder %s1575_s16, %s1569_s20 }
 0x367   : > { %1525 = vpow2.f32 %v1032_v48  ;;  %1096 = vmatprep.subr.bf16.mxu0 %v1065_v25  ;;  %1139 = vmatprep.subr.bf16.mxu1 %v1065_v25  ;;  %v312_v5 = vpop.permute.xlu1 %311 }
 0x368   : > { %v1516_v6 = vpop.eup %1515  ;;  %1527 = vpow2.f32 %v1034_v39  ;;  %v373_v61 = vadd.f32 %v2273_v43, %v312_v5  ;;  %v375_v36 = vadd.f32 %v2274_v62, %v312_v5  ;;  %p1578_p2 = por %p1577_p13, %p1576_p6 }
 0x369   : > { %v1518_v41 = vpop.eup %1517  ;;  %1529 = vpow2.f32 %v1036_v40  ;;  %1097 = vmatpush1.bf16.xpose.msra.mxu0 %v1064_v58  ;;  %1140 = vmatpush1.bf16.xpose.msra.mxu1 %v1064_v58  ;;  %v307_v30 = vpop.permute.xlu0 %306 }
 0x36a   : > { %v1520_v32 = vpop.eup %1519  ;;  %v369_v7 = vadd.f32 %v2275_v17, %v307_v30  ;;  %v371_v14 = vadd.f32 %v2276_v9, %v307_v30  ;;  %p1579_p5 = pnand %p1578_p2, %p1572_p0 }
 0x36b   : > { %v1522_v51 = vpop.eup %1521  ;;  %v1066_v22 = vpack.c.bf16 %v1520_v32, %v1516_v6 }
 0x36c   : > { %v385_v63 = vpack.c.bf16 %v373_v61, %v369_v7  ;;  %v386_v0 = vpack.c.bf16 %v375_v36, %v371_v14  ;;  %v1067_v45 = vpack.c.bf16 %v1522_v51, %v1518_v41 }
 0x36e   : > { %1098 = vmatprep.subr.bf16.mxu0 %v1067_v45  ;;  %1141 = vmatprep.subr.bf16.mxu1 %v1067_v45 }
 0x36f   : > { %1145 = vmatprep.mubr.bf16.mxu1 %v386_v0 }
 0x370   : > { %v1524_v46 = vpop.eup %1523 }
 0x371   : > { %v1526_v27 = vpop.eup %1525  ;;  %1099 = vmatpush1.bf16.xpose.msra.mxu0 %v1066_v22  ;;  %1142 = vmatpush1.bf16.xpose.msra.mxu1 %v1066_v22 }
 0x372   : > { %v1528_v28 = vpop.eup %1527 }
 0x373   : > { %v1530_v47 = vpop.eup %1529  ;;  %v1068_v49 = vpack.c.bf16 %v1528_v28, %v1524_v46 }
 0x374   : > { %v1069_v52 = vpack.c.bf16 %v1530_v47, %v1526_v27 }
 0x376   : > { %1100 = vmatprep.subr.bf16.mxu0 %v1069_v52  ;;  %1143 = vmatprep.subr.bf16.mxu1 %v1069_v52 }
 0x379   : > { %1101 = vmatpush1.bf16.xpose.msra.mxu0 %v1068_v49  ;;  %1144 = vmatpush1.bf16.xpose.msra.mxu1 %v1068_v49 }
 0x380   : > { %1103 = vmatmul.mubr.bf16.vlgmr.msra.gmra.mrb[8].mxu0 %v1657_v42  ;;  %1146 = vmatmul.mubr.bf16.vlgmr.msra.gmra.mrb[68].mxu1 %v385_v63 }
 0x453   : > { %v1104_v29 = vpop.f32.mrb[8].mxu0  ;;  %v1147_v31 = vpop.f32.mrb[68].mxu1 }
 0x454   : > { %1531 = vrcp.f32 %v1104_v29  ;;  %v1106_v18 = vpop.f32.mrb[9].mxu0  ;;  %v1149_v53 = vpop.f32.mrb[69].mxu1 }
 0x455   : > { %1533 = vrcp.f32 %v1106_v18  ;;  %v1108_v11 = vpop.f32.mrb[10].mxu0  ;;  %v1151_v12 = vpop.f32.mrb[70].mxu1 }
 0x456   : > { %v1109_v44 = vpop.f32.mrb[11].mxu0  ;;  %v1153_v55 = vpop.f32.mrb[71].mxu1 }
 0x45e   : > { %v1532_v4 = vpop.eup %1531 }
 0x45f   : > { %v1534_v13 = vpop.eup %1533  ;;  %v1162_v42 = vrot.slane %v1532_v4, %v1161_v56 }
 0x460   : > { %v1166_v2 = vrot.slane %v1534_v13, %v1161_v56 }
 0x461   : > { %v1167_v16 = vmul.f32 %v1162_v42, %v1147_v31  ;;  %v1169_v1 = vmul.f32 %v1162_v42, %v1151_v12 }
 0x462   : > { %v1168_v33 = vmul.f32 %v1166_v2, %v1149_v53  ;;  %v1170_v34 = vmul.f32 %v1166_v2, %v1153_v55 }
 0x463   : > { %v1172_v50 = vmul.f32 %v1171_v60, %v1167_v16  ;;  %v1174_v3 = vmul.f32 %v1171_v60, %v1169_v1 }
 0x464   : > { %v1173_v35 = vmul.f32 %v1171_v60, %v1168_v33  ;;  %v1175_v37 = vmul.f32 %v1171_v60, %v1170_v34 }
 0x465   : > { %v1176_v26 = vadd.f32 %v1535_v38, %v1172_v50  ;;  %v1178_v10 = vadd.f32 %v1536_v8, %v1174_v3 }
 0x466   : > { %v1177_v58 = vadd.f32 %v1537_v57, %v1173_v35  ;;  %v1179_v24 = vadd.f32 %v1538_v15, %v1175_v37 }
 0x467   : > { %1180 = vst [vmem:[%s284_s22] sm:$0xff] %v1176_v26  ;;  %1182 = vst [vmem:[%s284_s22 + $0x10] sm:$0xff] %v1178_v10 }
 0x468   : > { %1181 = vst [vmem:[%s284_s22 + $0x8] sm:$0xff] %v1177_v58  ;;  %1183 = vst [vmem:[%s284_s22 + $0x18] sm:$0xff] %v1179_v24 }
 0x469   : > { %1582 = shalt.err (!%p1579_p5)
}
 0x46a   : > { %s1583_s15 = scalar_lea.hbm %s2167_s26, 512  ;;  %s1587_s21 = scalar_lea.hbm %s2222_s6, 1024 }
 0x46b   : > { %p1584_p4 = scmp.ne.s32.totalorder %s2167_s26, %s1583_s15  ;;  %p1588_p12 = scmp.lt.u32.totalorder %s2167_s26, %s2222_s6 }
 0x46c   : > { %p1589_p1 = scmp.lt.u32.totalorder %s1587_s21, %s1583_s15  ;;  %p1591_p8 = scmp.lt.u32.totalorder %s1583_s15, %s2167_s26 }
 0x46d   : > { %p1585_p7 = pnand %p1584_p4, %p2277_p9 }
 0x46e   : > { %p1590_p3 = por %p1589_p1, %p1588_p12 }
 0x46f   : > { %p1586_p10 = pneg %p1585_p7 }
 0x470   : > { %p1592_p11 = por %p1591_p8, %p1590_p3 }
 0x472   : > { %p1593_p0 = pnand %p1592_p11, %p1586_p10 }
 0x474   : > { %1596 = shalt.err (!%p1593_p0)
}
 0x475   : > { %s1659_s8 = smov 256   ;;  %s1660_s17 = smov 16  }
 0x476   : > { %1333 = dma.vmem_to_hbm [thread:$0]  (%p2277_p9), %s2158_s5, 512, %s2167_s26, %s1185_s18, %s1659_s8, %s1659_s8, %s1660_s17  }
 0x477 PF: > { %s1215_s20 = sand.u32 1, %s1631_s23   ;;  %p2278_p6 = scmp.ne.s32.totalorder %s2240_s13, 0 }
 0x478   : > { %p2279_p13 = scmp.ge.s32.totalorder %s1651_s28, 2  ;;  %s1216_s29 = scalar_lea.sflag [#allocation7], %s1215_s20 }
 0x47a   : > { %p1340_p2 = pnand %p2279_p13, %p2278_p6 }
 0x47c   : > { %1626 = dma.done.wait (!%p1340_p2), %s1216_s29, 512  }
 0x47d   : > { %1628 = vsyncadd (!%p1340_p2), %s1216_s29, 4294966784  ;;  %s23_s28 = sadd.s32 1, %s1651_s28   ;;  %s2280_s23 = smov %s1635_s24 }
 0x47e   : > { %p20_p5 = scmp.ge.s32.totalorder %s23_s28, 4   ;;  %s2281_s24 = smov %s1639_s25 }
 0x47f   : > { %s2282_s25 = smov %s1755_s12  ;;  %s2283_s26 = smov %s1647_s27 }
 0x480   : > { %s2284_s27 = smov %s2286_s30  ;;  %22 = sbr.rel (!%p20_p5) target bundleno = 8 (0x8), region = 94 }
 0x487   :  { %1221 = vsyncpa [#allocation6], 1 }
 0x488   :  { %1223 = vsyncpa [#allocation6 + $0x1], 1 }
 0x489   :  { %1224 = vsyncpa [#allocation7], 1 }
 0x48a   :  { %1226 = vsyncpa [#allocation7 + $0x1], 1 }

</bundles_post_ra>
